<compile_context>
chip_gen: v6e
topology: v6e:2x2x1
jax: 0.10.0
libtpu: 0.0.40
codegen_flags: <defaults>
</compile_context>

<pallas_src>
import functools

import jax
import jax.numpy as jnp
from jax.experimental import pallas as pl
from jax.experimental.pallas import tpu as pltpu


def _round_up(x, m):
    return (x + m - 1) // m * m


def _prior_kernel(h_ref, w1_ref, b1_ref, wh_ref, bh_ref, out_ref, *, z_dim, pack):
    # prior_encoder: Linear + ReLU.  MXU matmul with f32 accumulation; bias add
    # and ReLU in f32 regardless of the streaming dtype.
    enc = jnp.dot(h_ref[...], w1_ref[...], preferred_element_type=jnp.float32)
    enc = jnp.maximum(enc + b1_ref[...], 0.0)

    # Fused mean|std heads: one MXU matmul over the concatenated head weights.
    # Cast enc to the streaming dtype so the MXU runs at native (bf16) rate.
    y = jnp.dot(enc.astype(wh_ref.dtype), wh_ref[...],
                preferred_element_type=jnp.float32) + bh_ref[...]

    # Left z_dim lanes -> relu (mean head); right z_dim lanes -> softplus (std
    # head).  Stable softplus: max(y, 0) + log1p(exp(-|y|)).
    relu_y = jnp.maximum(y, 0.0)
    softplus_y = relu_y + jnp.log1p(jnp.exp(-jnp.abs(y)))
    col = jax.lax.broadcasted_iota(jnp.int32, y.shape, 1)
    act = jnp.where(col < z_dim, relu_y, softplus_y)

    if pack == 1:
        out_ref[...] = act.astype(out_ref.dtype)
    else:
        # Lane-dense packing: fold `pack` consecutive row-groups of the batch
        # tile into the lane axis so the output block is >=128 lanes wide
        # (full-width unmasked stores instead of vst.msk on 2*z_dim lanes).
        q = act.shape[0] // pack
        packed = jnp.concatenate(
            [act[g * q:(g + 1) * q] for g in range(pack)], axis=1)
        out_ref[...] = packed.astype(out_ref.dtype)


def prior_forward(h, params, *, max_tile_n=8192, compute_dtype=jnp.bfloat16,
                  core_parallel=False):
    """h: (N, h_dim). Returns (prior_mean, prior_std), each (N, z_dim) float32.

    compute_dtype: dtype in which h and the weight matrices are streamed / fed
      to the MXU (bf16 halves HBM traffic, native MXU rate on v6e/v7x);
      accumulation, biases, activations and the output stay float32.
    core_parallel: set True on v7x to shard the batch grid across both
      TensorCores; leave False on single-TC chips (v5e/v6e).
    """
    w1, b1, wm, bm, ws, bs = (params[k] for k in ("w1", "b1", "wm", "bm", "ws", "bs"))
    n, h_dim = h.shape
    hid = w1.shape[1]
    z_dim = wm.shape[1]
    out_w = 2 * z_dim

    # Fuse the two heads -> one MXU matmul, one lane-denser output slab.
    wh = jnp.concatenate([wm, ws], axis=1)                   # (hid, 2*z_dim)
    bh = jnp.concatenate([bm, bs], axis=1).astype(jnp.float32)
    b1 = b1.astype(jnp.float32)

    # Stream h and the weight matrices in compute_dtype (bf16 by default).
    h_c = h.astype(compute_dtype)
    w1_c = w1.astype(compute_dtype)
    wh_c = wh.astype(compute_dtype)
    in_item = jnp.dtype(compute_dtype).itemsize

    # Lane-dense output packing factor (only needed while 2*z_dim < 128).
    pack = max(1, 128 // out_w) if out_w < 128 else 1
    unit = 8 * pack                                           # sublane alignment

    # Batch tile: as large as reasonable, multiple of `unit`, shrunk if the
    # streamed double buffers would not leave headroom on a 64 MiB (v7x) part.
    tile_n = min(max_tile_n, _round_up(n, unit))
    tile_n = max(unit, _round_up(tile_n, unit))

    def _stream_bytes(t):
        return 2 * t * h_dim * in_item + 2 * t * out_w * 4   # double-buffered in/out

    while tile_n > unit and _stream_bytes(tile_n) > (24 << 20):
        tile_n = max(unit, _round_up(tile_n // 2, unit))

    # Degenerate case only (whole input is one block smaller than the tile):
    # pad the tiny array instead of relying on block_shape > array_shape.
    if n < tile_n:
        h_c = jnp.pad(h_c, ((0, tile_n - n), (0, 0)))

    grid_n = pl.cdiv(n, tile_n)        # ragged last block is masked by Pallas
    n_pad = grid_n * tile_n

    weight_bytes = (2 * (h_dim * hid + hid * out_w) * in_item
                    + 2 * (hid + out_w) * 4)
    vmem_limit = int(min(64 << 20,
                         max(32 << 20, 2 * (_stream_bytes(tile_n) + weight_bytes))))

    dim_sem = (pltpu.CORE_PARALLEL,) if core_parallel else ("parallel",)
    cost = pl.CostEstimate(
        flops=2 * n_pad * (h_dim * hid + hid * out_w),
        transcendentals=2 * n_pad * out_w,                    # exp + log1p
        bytes_accessed=(n_pad * h_dim * in_item + n_pad * out_w * 4
                        + (h_dim * hid + hid * out_w) * in_item
                        + (hid + out_w) * 4),
    )

    def run(pack_i, buffered_weights):
        q_i = tile_n // pack_i

        def wspec(shape):
            if buffered_weights:
                # Block index never changes -> a single VMEM buffer suffices.
                return pl.BlockSpec(shape, lambda i: (0, 0),
                                    pipeline_mode=pl.Buffered(1))
            return pl.BlockSpec(shape, lambda i: (0, 0))

        out = pl.pallas_call(
            functools.partial(_prior_kernel, z_dim=z_dim, pack=pack_i),
            out_shape=jax.ShapeDtypeStruct((grid_n * q_i, pack_i * out_w),
                                           jnp.float32),
            grid=(grid_n,),
            in_specs=[
                pl.BlockSpec((tile_n, h_dim), lambda i: (i, 0)),
                wspec((h_dim, hid)),
                wspec((1, hid)),
                wspec((hid, out_w)),
                wspec((1, out_w)),
            ],
            out_specs=pl.BlockSpec((q_i, pack_i * out_w), lambda i: (i, 0)),
            compiler_params=pltpu.CompilerParams(
                dimension_semantics=dim_sem,
                vmem_limit_bytes=vmem_limit,
            ),
            cost_estimate=cost,
        )(h_c, w1_c, b1, wh_c, bh)
        return out, q_i, pack_i

    # Preferred configuration first; conservative fallbacks (evaluated eagerly)
    # if a Mosaic version rejects single-buffered weights or the lane-packing
    # concatenate.  The final config is the previously-validated layout.
    attempts, seen = [], set()
    for cfg in ((pack, True), (pack, False), (1, False)):
        if cfg not in seen:
            seen.add(cfg)
            attempts.append(cfg)
    out = q_used = pack_used = None
    for idx, (p_i, buf_i) in enumerate(attempts):
        try:
            out, q_used, pack_used = run(p_i, buf_i)
            break
        except Exception:
            if idx == len(attempts) - 1:
                raise

    # Undo the lane packing (cheap: output is only N x 2*z_dim) and drop rows
    # belonging to the ragged last block / degenerate pad.
    out = out.reshape(grid_n, q_used, pack_used, out_w)
    out = out.transpose(0, 2, 1, 3).reshape(n_pad, out_w)
    prior_mean = out[:n, :z_dim]
    prior_std = out[:n, z_dim:]
    return prior_mean, prior_std


def init_prior_params(key, h_dim, prior_hid_dim, z_dim, dtype=jnp.float32):
    """Deterministic synthetic parameters with PyTorch nn.Linear-like init
    (stored transposed so the kernel computes x @ W)."""
    ks = jax.random.split(key, 6)
    s1 = 1.0 / jnp.sqrt(h_dim)
    s2 = 1.0 / jnp.sqrt(prior_hid_dim)
    return {
        "w1": jax.random.uniform(ks[0], (h_dim, prior_hid_dim), dtype, -s1, s1),
        "b1": jax.random.uniform(ks[1], (1, prior_hid_dim), dtype, -s1, s1),
        "wm": jax.random.uniform(ks[2], (prior_hid_dim, z_dim), dtype, -s2, s2),
        "bm": jax.random.uniform(ks[3], (1, z_dim), dtype, -s2, s2),
        "ws": jax.random.uniform(ks[4], (prior_hid_dim, z_dim), dtype, -s2, s2),
        "bs": jax.random.uniform(ks[5], (1, z_dim), dtype, -s2, s2),
    }


def _reference(h, p):
    enc = jnp.maximum(h @ p["w1"] + p["b1"], 0.0)
    mean = jnp.maximum(enc @ p["wm"] + p["bm"], 0.0)
    std = jax.nn.softplus(enc @ p["ws"] + p["bs"])
    return mean, std


def _reference_quantized(h, p, dtype):
    """Reference modelling the kernel's streaming quantization points
    (h / weight matrices / enc rounded to `dtype`, math and biases in f32)."""
    def q(x):
        return x.astype(dtype).astype(jnp.float32)
    enc = jnp.maximum(q(h) @ q(p["w1"]) + p["b1"], 0.0)
    enc = q(enc)
    mean = jnp.maximum(enc @ q(p["wm"]) + p["bm"], 0.0)
    std = jax.nn.softplus(enc @ q(p["ws"]) + p["bs"])
    return mean, std


if __name__ == "__main__":
    key = jax.random.PRNGKey(0)
    k1, k2, k3, kp = jax.random.split(key, 4)

    h_dim, prior_hid_dim, z_dim = 32, 64, 16
    params = init_prior_params(kp, h_dim, prior_hid_dim, z_dim)

    # Case 1: small batch, exact f32 path (matches the PyTorch module numerics).
    h1 = jax.random.normal(k1, (8, h_dim), jnp.float32)
    mean1, std1 = prior_forward(h1, params, compute_dtype=jnp.float32)
    jax.block_until_ready((mean1, std1))
    r_mean1, r_std1 = _reference(h1, params)
    assert mean1.shape == (8, z_dim) and std1.shape == (8, z_dim)
    assert jnp.allclose(mean1, r_mean1, atol=1e-5, rtol=1e-5)
    assert jnp.allclose(std1, r_std1, atol=1e-5, rtol=1e-5)

    # Case 2: ragged batch (37 rows), small tile -> multi-step grid with a
    # masked last block; default bf16 streaming.
    h2 = jax.random.normal(k2, (37, h_dim), jnp.float32)
    mean2, std2 = prior_forward(h2, params, max_tile_n=16)
    jax.block_until_ready((mean2, std2))
    r_mean2, r_std2 = _reference_quantized(h2, params, jnp.bfloat16)
    assert jnp.allclose(mean2, r_mean2, atol=2e-2, rtol=2e-2)
    assert jnp.allclose(std2, r_std2, atol=2e-2, rtol=2e-2)

    # Case 3: larger batch, several grid steps + ragged tail, bf16 streaming.
    h3 = jax.random.normal(k3, (1000, h_dim), jnp.float32)
    mean3, std3 = prior_forward(h3, params, max_tile_n=256)
    jax.block_until_ready((mean3, std3))
    r_mean3, r_std3 = _reference_quantized(h3, params, jnp.bfloat16)
    assert jnp.allclose(mean3, r_mean3, atol=2e-2, rtol=2e-2)
    assert jnp.allclose(std3, r_std3, atol=2e-2, rtol=2e-2)

    print("KERNEL_OK")
</pallas_src>

<mosaic_0001>
module attributes {stable_mosaic.version = 11 : i64} {
  func.func @_prior_kernel(%arg0: i32, %arg1: memref<32x32xf32, #tpu.memory_space<vmem>>, %arg2: memref<32x64xf32, #tpu.memory_space<vmem>>, %arg3: memref<1x64xf32, #tpu.memory_space<vmem>>, %arg4: memref<64x32xf32, #tpu.memory_space<vmem>>, %arg5: memref<1x32xf32, #tpu.memory_space<vmem>>, %arg6: memref<8x128xf32, #tpu.memory_space<vmem>>) attributes {dimension_semantics = [#tpu.dimension_semantics<parallel>], iteration_bounds = array<i64: 1>, scalar_prefetch = 0 : i64, scratch_operands = 0 : i64, tpu.core_type = #tpu.core_type<tc>, window_params = [{transform_indices = @transform_0, window_bounds = array<i64: 32, 32>}, {pipeline_mode = #tpu.pipeline_mode<synchronous>, transform_indices = @transform_1, window_bounds = array<i64: 32, 64>}, {pipeline_mode = #tpu.pipeline_mode<synchronous>, transform_indices = @transform_2, window_bounds = array<i64: 1, 64>}, {pipeline_mode = #tpu.pipeline_mode<synchronous>, transform_indices = @transform_3, window_bounds = array<i64: 64, 32>}, {pipeline_mode = #tpu.pipeline_mode<synchronous>, transform_indices = @transform_4, window_bounds = array<i64: 1, 32>}, {transform_indices = @transform_5, window_bounds = array<i64: 8, 128>}]} {
    %c0 = arith.constant 0 : index
    %c0_0 = arith.constant 0 : index
    %0 = vector.load %arg1[%c0, %c0_0] : memref<32x32xf32, #tpu.memory_space<vmem>>, vector<32x32xf32>
    %c0_1 = arith.constant 0 : index
    %c0_2 = arith.constant 0 : index
    %1 = vector.load %arg2[%c0_1, %c0_2] : memref<32x64xf32, #tpu.memory_space<vmem>>, vector<32x64xf32>
    %cst = arith.constant dense<0.000000e+00> : vector<32x64xf32>
    %2 = tpu.matmul %0, %1, %cst {dimension_numbers = #tpu.dot_dimension_numbers<[1], [0], [0], [1], [0, 0, 1, 1], [], []>} : vector<32x32xf32>, vector<32x64xf32>, vector<32x64xf32> -> vector<32x64xf32>
    %c0_3 = arith.constant 0 : index
    %c0_4 = arith.constant 0 : index
    %3 = vector.load %arg3[%c0_3, %c0_4] : memref<1x64xf32, #tpu.memory_space<vmem>>, vector<1x64xf32>
    %4 = vector.broadcast %3 : vector<1x64xf32> to vector<32x64xf32>
    %5 = arith.addf %2, %4 : vector<32x64xf32>
    %cst_5 = arith.constant 0.000000e+00 : f32
    %6 = vector.broadcast %cst_5 : f32 to vector<32x64xf32>
    %7 = arith.maximumf %5, %6 : vector<32x64xf32>
    %c0_6 = arith.constant 0 : index
    %c0_7 = arith.constant 0 : index
    %8 = vector.load %arg4[%c0_6, %c0_7] : memref<64x32xf32, #tpu.memory_space<vmem>>, vector<64x32xf32>
    %cst_8 = arith.constant dense<0.000000e+00> : vector<32x32xf32>
    %9 = tpu.matmul %7, %8, %cst_8 {dimension_numbers = #tpu.dot_dimension_numbers<[1], [0], [0], [1], [0, 0, 1, 1], [], []>} : vector<32x64xf32>, vector<64x32xf32>, vector<32x32xf32> -> vector<32x32xf32>
    %c0_9 = arith.constant 0 : index
    %c0_10 = arith.constant 0 : index
    %10 = vector.load %arg5[%c0_9, %c0_10] : memref<1x32xf32, #tpu.memory_space<vmem>>, vector<1x32xf32>
    %11 = vector.broadcast %10 : vector<1x32xf32> to vector<32x32xf32>
    %12 = arith.addf %9, %11 : vector<32x32xf32>
    %cst_11 = arith.constant 0.000000e+00 : f32
    %13 = vector.broadcast %cst_11 : f32 to vector<32x32xf32>
    %14 = arith.maximumf %12, %13 : vector<32x32xf32>
    %15 = math.absf %12 : vector<32x32xf32>
    %cst_12 = arith.constant 0.000000e+00 : f32
    %16 = vector.broadcast %cst_12 : f32 to vector<32x32xf32>
    %17 = arith.subf %16, %15 : vector<32x32xf32>
    %18 = math.exp %17 : vector<32x32xf32>
    %19 = math.log1p %18 : vector<32x32xf32>
    %20 = arith.addf %14, %19 : vector<32x32xf32>
    %21 = tpu.iota {dimensions = array<i32: 1>} : vector<32x32xi32>
    %c16_i32 = arith.constant 16 : i32
    %22 = vector.broadcast %c16_i32 : i32 to vector<32x32xi32>
    %23 = arith.cmpi slt, %21, %22 : vector<32x32xi32>
    %24 = arith.select %23, %14, %20 : vector<32x32xi1>, vector<32x32xf32>
    %25 = vector.extract_strided_slice %24 {offsets = [0, 0], sizes = [8, 32], strides = [1, 1]} : vector<32x32xf32> to vector<8x32xf32>
    %26 = vector.extract_strided_slice %24 {offsets = [8, 0], sizes = [8, 32], strides = [1, 1]} : vector<32x32xf32> to vector<8x32xf32>
    %27 = vector.extract_strided_slice %24 {offsets = [16, 0], sizes = [8, 32], strides = [1, 1]} : vector<32x32xf32> to vector<8x32xf32>
    %28 = vector.extract_strided_slice %24 {offsets = [24, 0], sizes = [8, 32], strides = [1, 1]} : vector<32x32xf32> to vector<8x32xf32>
    %29 = tpu.concatenate %25, %26, %27, %28 in 1 : vector<8x32xf32>, vector<8x32xf32>, vector<8x32xf32>, vector<8x32xf32> -> vector<8x128xf32>
    %c0_13 = arith.constant 0 : index
    %c0_14 = arith.constant 0 : index
    %30 = vector.load %arg6[%c0_13, %c0_14] : memref<8x128xf32, #tpu.memory_space<vmem>>, vector<8x128xf32>
    tpu.vector_store %arg6[%c0_13, %c0_14], %29 {strides = array<i32>} : memref<8x128xf32, #tpu.memory_space<vmem>>, vector<8x128xf32>,
    return
  }
  func.func @transform_0(%arg0: i32) -> (i32, i32) {
    %c0_i32 = arith.constant 0 : i32
    %c0_i32_0 = arith.constant 0 : i32
    return %arg0, %c0_i32 : i32, i32
  }
  func.func @transform_1(%arg0: i32) -> (i32, i32) {
    %c0_i32 = arith.constant 0 : i32
    %c0_i32_0 = arith.constant 0 : i32
    %c0_i32_1 = arith.constant 0 : i32
    return %c0_i32, %c0_i32_0 : i32, i32
  }
  func.func @transform_2(%arg0: i32) -> (i32, i32) {
    %c0_i32 = arith.constant 0 : i32
    %c0_i32_0 = arith.constant 0 : i32
    %c0_i32_1 = arith.constant 0 : i32
    return %c0_i32, %c0_i32_0 : i32, i32
  }
  func.func @transform_3(%arg0: i32) -> (i32, i32) {
    %c0_i32 = arith.constant 0 : i32
    %c0_i32_0 = arith.constant 0 : i32
    %c0_i32_1 = arith.constant 0 : i32
    return %c0_i32, %c0_i32_0 : i32, i32
  }
  func.func @transform_4(%arg0: i32) -> (i32, i32) {
    %c0_i32 = arith.constant 0 : i32
    %c0_i32_0 = arith.constant 0 : i32
    %c0_i32_1 = arith.constant 0 : i32
    return %c0_i32, %c0_i32_0 : i32, i32
  }
  func.func @transform_5(%arg0: i32) -> (i32, i32) {
    %c0_i32 = arith.constant 0 : i32
    %c0_i32_0 = arith.constant 0 : i32
    return %arg0, %c0_i32 : i32, i32
  }
}

module attributes {stable_mosaic.version = 11 : i64} {
  func.func @_prior_kernel(%arg0: i32, %arg1: memref<32x32xf32, #tpu.memory_space<vmem>>, %arg2: memref<32x64xf32, #tpu.memory_space<vmem>>, %arg3: memref<1x64xf32, #tpu.memory_space<vmem>>, %arg4: memref<64x32xf32, #tpu.memory_space<vmem>>, %arg5: memref<1x32xf32, #tpu.memory_space<vmem>>, %arg6: memref<8x128xf32, #tpu.memory_space<vmem>>) attributes {dimension_semantics = [#tpu.dimension_semantics<parallel>], iteration_bounds = array<i64: 1>, scalar_prefetch = 0 : i64, scratch_operands = 0 : i64, tpu.core_type = #tpu.core_type<tc>, window_params = [{transform_indices = @transform_0, window_bounds = array<i64: 32, 32>}, {pipeline_mode = #tpu.pipeline_mode<synchronous>, transform_indices = @transform_1, window_bounds = array<i64: 32, 64>}, {pipeline_mode = #tpu.pipeline_mode<synchronous>, transform_indices = @transform_2, window_bounds = array<i64: 1, 64>}, {pipeline_mode = #tpu.pipeline_mode<synchronous>, transform_indices = @transform_3, window_bounds = array<i64: 64, 32>}, {pipeline_mode = #tpu.pipeline_mode<synchronous>, transform_indices = @transform_4, window_bounds = array<i64: 1, 32>}, {transform_indices = @transform_5, window_bounds = array<i64: 8, 128>}]} {
    %c0 = arith.constant 0 : index
    %c0_0 = arith.constant 0 : index
    %0 = vector.load %arg1[%c0, %c0_0] : memref<32x32xf32, #tpu.memory_space<vmem>>, vector<32x32xf32>
    %c0_1 = arith.constant 0 : index
    %c0_2 = arith.constant 0 : index
    %1 = vector.load %arg2[%c0_1, %c0_2] : memref<32x64xf32, #tpu.memory_space<vmem>>, vector<32x64xf32>
    %cst = arith.constant dense<0.000000e+00> : vector<32x64xf32>
    %2 = tpu.matmul %0, %1, %cst {dimension_numbers = #tpu.dot_dimension_numbers<[1], [0], [0], [1], [0, 0, 1, 1], [], []>} : vector<32x32xf32>, vector<32x64xf32>, vector<32x64xf32> -> vector<32x64xf32>
    %c0_3 = arith.constant 0 : index
    %c0_4 = arith.constant 0 : index
    %3 = vector.load %arg3[%c0_3, %c0_4] : memref<1x64xf32, #tpu.memory_space<vmem>>, vector<1x64xf32>
    %4 = vector.broadcast %3 : vector<1x64xf32> to vector<32x64xf32>
    %5 = arith.addf %2, %4 : vector<32x64xf32>
    %cst_5 = arith.constant 0.000000e+00 : f32
    %6 = vector.broadcast %cst_5 : f32 to vector<32x64xf32>
    %7 = arith.maximumf %5, %6 : vector<32x64xf32>
    %c0_6 = arith.constant 0 : index
    %c0_7 = arith.constant 0 : index
    %8 = vector.load %arg4[%c0_6, %c0_7] : memref<64x32xf32, #tpu.memory_space<vmem>>, vector<64x32xf32>
    %cst_8 = arith.constant dense<0.000000e+00> : vector<32x32xf32>
    %9 = tpu.matmul %7, %8, %cst_8 {dimension_numbers = #tpu.dot_dimension_numbers<[1], [0], [0], [1], [0, 0, 1, 1], [], []>} : vector<32x64xf32>, vector<64x32xf32>, vector<32x32xf32> -> vector<32x32xf32>
    %c0_9 = arith.constant 0 : index
    %c0_10 = arith.constant 0 : index
    %10 = vector.load %arg5[%c0_9, %c0_10] : memref<1x32xf32, #tpu.memory_space<vmem>>, vector<1x32xf32>
    %11 = vector.broadcast %10 : vector<1x32xf32> to vector<32x32xf32>
    %12 = arith.addf %9, %11 : vector<32x32xf32>
    %cst_11 = arith.constant 0.000000e+00 : f32
    %13 = vector.broadcast %cst_11 : f32 to vector<32x32xf32>
    %14 = arith.maximumf %12, %13 : vector<32x32xf32>
    %15 = math.absf %12 : vector<32x32xf32>
    %cst_12 = arith.constant 0.000000e+00 : f32
    %16 = vector.broadcast %cst_12 : f32 to vector<32x32xf32>
    %17 = arith.subf %16, %15 : vector<32x32xf32>
    %18 = math.exp %17 : vector<32x32xf32>
    %19 = math.log1p %18 : vector<32x32xf32>
    %20 = arith.addf %14, %19 : vector<32x32xf32>
    %21 = tpu.iota {dimensions = array<i32: 1>} : vector<32x32xi32>
    %c16_i32 = arith.constant 16 : i32
    %22 = vector.broadcast %c16_i32 : i32 to vector<32x32xi32>
    %23 = arith.cmpi slt, %21, %22 : vector<32x32xi32>
    %24 = arith.select %23, %14, %20 : vector<32x32xi1>, vector<32x32xf32>
    %25 = vector.extract_strided_slice %24 {offsets = [0, 0], sizes = [8, 32], strides = [1, 1]} : vector<32x32xf32> to vector<8x32xf32>
    %26 = vector.extract_strided_slice %24 {offsets = [8, 0], sizes = [8, 32], strides = [1, 1]} : vector<32x32xf32> to vector<8x32xf32>
    %27 = vector.extract_strided_slice %24 {offsets = [16, 0], sizes = [8, 32], strides = [1, 1]} : vector<32x32xf32> to vector<8x32xf32>
    %28 = vector.extract_strided_slice %24 {offsets = [24, 0], sizes = [8, 32], strides = [1, 1]} : vector<32x32xf32> to vector<8x32xf32>
    %29 = tpu.concatenate %25, %26, %27, %28 in 1 : vector<8x32xf32>, vector<8x32xf32>, vector<8x32xf32>, vector<8x32xf32> -> vector<8x128xf32>
    %c0_13 = arith.constant 0 : index
    %c0_14 = arith.constant 0 : index
    %30 = vector.load %arg6[%c0_13, %c0_14] : memref<8x128xf32, #tpu.memory_space<vmem>>, vector<8x128xf32>
    tpu.vector_store %arg6[%c0_13, %c0_14], %29 {strides = array<i32>} : memref<8x128xf32, #tpu.memory_space<vmem>>, vector<8x128xf32>,
    return
  }
  func.func @transform_0(%arg0: i32) -> (i32, i32) {
    %c0_i32 = arith.constant 0 : i32
    %c0_i32_0 = arith.constant 0 : i32
    return %arg0, %c0_i32 : i32, i32
  }
  func.func @transform_1(%arg0: i32) -> (i32, i32) {
    %c0_i32 = arith.constant 0 : i32
    %c0_i32_0 = arith.constant 0 : i32
    %c0_i32_1 = arith.constant 0 : i32
    return %c0_i32, %c0_i32_0 : i32, i32
  }
  func.func @transform_2(%arg0: i32) -> (i32, i32) {
    %c0_i32 = arith.constant 0 : i32
    %c0_i32_0 = arith.constant 0 : i32
    %c0_i32_1 = arith.constant 0 : i32
    return %c0_i32, %c0_i32_0 : i32, i32
  }
  func.func @transform_3(%arg0: i32) -> (i32, i32) {
    %c0_i32 = arith.constant 0 : i32
    %c0_i32_0 = arith.constant 0 : i32
    %c0_i32_1 = arith.constant 0 : i32
    return %c0_i32, %c0_i32_0 : i32, i32
  }
  func.func @transform_4(%arg0: i32) -> (i32, i32) {
    %c0_i32 = arith.constant 0 : i32
    %c0_i32_0 = arith.constant 0 : i32
    %c0_i32_1 = arith.constant 0 : i32
    return %c0_i32, %c0_i32_0 : i32, i32
  }
  func.func @transform_5(%arg0: i32) -> (i32, i32) {
    %c0_i32 = arith.constant 0 : i32
    %c0_i32_0 = arith.constant 0 : i32
    return %arg0, %c0_i32 : i32, i32
  }
}

module attributes {stable_mosaic.version = 11 : i64} {
  func.func @_prior_kernel(%arg0: i32, %arg1: memref<32x32xf32, #tpu.memory_space<vmem>>, %arg2: memref<32x64xf32, #tpu.memory_space<vmem>>, %arg3: memref<1x64xf32, #tpu.memory_space<vmem>>, %arg4: memref<64x32xf32, #tpu.memory_space<vmem>>, %arg5: memref<1x32xf32, #tpu.memory_space<vmem>>, %arg6: memref<32x32xf32, #tpu.memory_space<vmem>>) attributes {dimension_semantics = [#tpu.dimension_semantics<parallel>], iteration_bounds = array<i64: 1>, scalar_prefetch = 0 : i64, scratch_operands = 0 : i64, tpu.core_type = #tpu.core_type<tc>, window_params = [{transform_indices = @transform_0, window_bounds = array<i64: 32, 32>}, {pipeline_mode = #tpu.pipeline_mode<synchronous>, transform_indices = @transform_1, window_bounds = array<i64: 32, 64>}, {pipeline_mode = #tpu.pipeline_mode<synchronous>, transform_indices = @transform_2, window_bounds = array<i64: 1, 64>}, {pipeline_mode = #tpu.pipeline_mode<synchronous>, transform_indices = @transform_3, window_bounds = array<i64: 64, 32>}, {pipeline_mode = #tpu.pipeline_mode<synchronous>, transform_indices = @transform_4, window_bounds = array<i64: 1, 32>}, {transform_indices = @transform_5, window_bounds = array<i64: 32, 32>}]} {
    %c0 = arith.constant 0 : index
    %c0_0 = arith.constant 0 : index
    %0 = vector.load %arg1[%c0, %c0_0] : memref<32x32xf32, #tpu.memory_space<vmem>>, vector<32x32xf32>
    %c0_1 = arith.constant 0 : index
    %c0_2 = arith.constant 0 : index
    %1 = vector.load %arg2[%c0_1, %c0_2] : memref<32x64xf32, #tpu.memory_space<vmem>>, vector<32x64xf32>
    %cst = arith.constant dense<0.000000e+00> : vector<32x64xf32>
    %2 = tpu.matmul %0, %1, %cst {dimension_numbers = #tpu.dot_dimension_numbers<[1], [0], [0], [1], [0, 0, 1, 1], [], []>} : vector<32x32xf32>, vector<32x64xf32>, vector<32x64xf32> -> vector<32x64xf32>
    %c0_3 = arith.constant 0 : index
    %c0_4 = arith.constant 0 : index
    %3 = vector.load %arg3[%c0_3, %c0_4] : memref<1x64xf32, #tpu.memory_space<vmem>>, vector<1x64xf32>
    %4 = vector.broadcast %3 : vector<1x64xf32> to vector<32x64xf32>
    %5 = arith.addf %2, %4 : vector<32x64xf32>
    %cst_5 = arith.constant 0.000000e+00 : f32
    %6 = vector.broadcast %cst_5 : f32 to vector<32x64xf32>
    %7 = arith.maximumf %5, %6 : vector<32x64xf32>
    %c0_6 = arith.constant 0 : index
    %c0_7 = arith.constant 0 : index
    %8 = vector.load %arg4[%c0_6, %c0_7] : memref<64x32xf32, #tpu.memory_space<vmem>>, vector<64x32xf32>
    %cst_8 = arith.constant dense<0.000000e+00> : vector<32x32xf32>
    %9 = tpu.matmul %7, %8, %cst_8 {dimension_numbers = #tpu.dot_dimension_numbers<[1], [0], [0], [1], [0, 0, 1, 1], [], []>} : vector<32x64xf32>, vector<64x32xf32>, vector<32x32xf32> -> vector<32x32xf32>
    %c0_9 = arith.constant 0 : index
    %c0_10 = arith.constant 0 : index
    %10 = vector.load %arg5[%c0_9, %c0_10] : memref<1x32xf32, #tpu.memory_space<vmem>>, vector<1x32xf32>
    %11 = vector.broadcast %10 : vector<1x32xf32> to vector<32x32xf32>
    %12 = arith.addf %9, %11 : vector<32x32xf32>
    %cst_11 = arith.constant 0.000000e+00 : f32
    %13 = vector.broadcast %cst_11 : f32 to vector<32x32xf32>
    %14 = arith.maximumf %12, %13 : vector<32x32xf32>
    %15 = math.absf %12 : vector<32x32xf32>
    %cst_12 = arith.constant 0.000000e+00 : f32
    %16 = vector.broadcast %cst_12 : f32 to vector<32x32xf32>
    %17 = arith.subf %16, %15 : vector<32x32xf32>
    %18 = math.exp %17 : vector<32x32xf32>
    %19 = math.log1p %18 : vector<32x32xf32>
    %20 = arith.addf %14, %19 : vector<32x32xf32>
    %21 = tpu.iota {dimensions = array<i32: 1>} : vector<32x32xi32>
    %c16_i32 = arith.constant 16 : i32
    %22 = vector.broadcast %c16_i32 : i32 to vector<32x32xi32>
    %23 = arith.cmpi slt, %21, %22 : vector<32x32xi32>
    %24 = arith.select %23, %14, %20 : vector<32x32xi1>, vector<32x32xf32>
    %c0_13 = arith.constant 0 : index
    %c0_14 = arith.constant 0 : index
    %25 = vector.load %arg6[%c0_13, %c0_14] : memref<32x32xf32, #tpu.memory_space<vmem>>, vector<32x32xf32>
    tpu.vector_store %arg6[%c0_13, %c0_14], %24 {strides = array<i32>} : memref<32x32xf32, #tpu.memory_space<vmem>>, vector<32x32xf32>,
    return
  }
  func.func @transform_0(%arg0: i32) -> (i32, i32) {
    %c0_i32 = arith.constant 0 : i32
    %c0_i32_0 = arith.constant 0 : i32
    return %arg0, %c0_i32 : i32, i32
  }
  func.func @transform_1(%arg0: i32) -> (i32, i32) {
    %c0_i32 = arith.constant 0 : i32
    %c0_i32_0 = arith.constant 0 : i32
    %c0_i32_1 = arith.constant 0 : i32
    return %c0_i32, %c0_i32_0 : i32, i32
  }
  func.func @transform_2(%arg0: i32) -> (i32, i32) {
    %c0_i32 = arith.constant 0 : i32
    %c0_i32_0 = arith.constant 0 : i32
    %c0_i32_1 = arith.constant 0 : i32
    return %c0_i32, %c0_i32_0 : i32, i32
  }
  func.func @transform_3(%arg0: i32) -> (i32, i32) {
    %c0_i32 = arith.constant 0 : i32
    %c0_i32_0 = arith.constant 0 : i32
    %c0_i32_1 = arith.constant 0 : i32
    return %c0_i32, %c0_i32_0 : i32, i32
  }
  func.func @transform_4(%arg0: i32) -> (i32, i32) {
    %c0_i32 = arith.constant 0 : i32
    %c0_i32_0 = arith.constant 0 : i32
    %c0_i32_1 = arith.constant 0 : i32
    return %c0_i32, %c0_i32_0 : i32, i32
  }
  func.func @transform_5(%arg0: i32) -> (i32, i32) {
    %c0_i32 = arith.constant 0 : i32
    %c0_i32_0 = arith.constant 0 : i32
    return %arg0, %c0_i32 : i32, i32
  }
}

</mosaic_0001>

<bundles_post_ra>
// kernel: tpu_custom_call.1
= control target key start
LH: loop header
LB: loop body
LE: loop exit
PB: predicated region body
PF: predicated region fallthrough
CT: control target
= control target key end

     0   :  { %vm36_vm0 = vcmask 261120   ;;  %s578_s0 = inlined_call_operand.vmem [shape: f32[32,32], index: 0, kind: input, shape index: {}]   ;;  %s579_s1 = inlined_call_operand.vmem [shape: f32[32,64], index: 1, kind: input, shape index: {}]   ;;  %s580_s2 = inlined_call_operand.vmem [shape: f32[1,64], index: 2, kind: input, shape index: {}]   ;;  %s581_s3 = inlined_call_operand.vmem [shape: f32[64,32], index: 3, kind: input, shape index: {}]   ;;  %s582_s4 = inlined_call_operand.vmem [shape: f32[1,32], index: 4, kind: input, shape index: {}]   ;;  %s583_s5 = inlined_call_operand.hbm [shape: f32[8,128], index: 5, kind: output, shape index: {}]  }
   0x1   :  { %v28_v0 = vld [vmem:[%s579_s1 + $0x18] sm:$0xff]  ;;  %v27_v1 = vld [vmem:[%s579_s1 + $0x10] sm:$0xff]  ;;  %v21_v2 = vld [vmem:[%s578_s0] sm:$0xff] }
   0x2   :  { %379 = vmatprep.subr.mxu0 %v28_v0  ;;  %v26_v3 = vld [vmem:[%s579_s1 + $0x8] sm:$0xff]  ;;  %387 = vmatprep.mubr.msk.f32.mxu0 %vm36_vm0, %v21_v2  ;;  %v145_v4 = vld [vmem:[%s581_s3 + $0x38] sm:$0xff]  ;;  %v144_v5 = vld [vmem:[%s581_s3 + $0x30] sm:$0xff] }
   0x3   :  { %380 = vmatpush3.msra.mxu0 %v28_v0  ;;  %393 = vmatprep.subr.mxu1 %v145_v4  ;;  %v25_v6 = vld [vmem:[%s579_s1] sm:$0xff]  ;;  %v143_v7 = vld [vmem:[%s581_s3 + $0x28] sm:$0xff] }
   0x4   :  { %381 = vmatprep.subr.mxu0 %v27_v1  ;;  %394 = vmatpush3.msra.mxu1 %v145_v4 }
   0x5   :  { %382 = vmatpush3.msra.mxu0 %v27_v1 }
   0x6   :  { %10 = vsyncpa [#allocation3], 0  ;;  %383 = vmatprep.subr.mxu0 %v26_v3  ;;  %395 = vmatprep.subr.mxu1 %v144_v5  ;;  %v22_v8 = vld [vmem:[%s578_s0 + $0x8] sm:$0xff]  ;;  %v142_v9 = vld [vmem:[%s581_s3 + $0x20] sm:$0xff]  ;;  %vm153_vm1 = vcmask 523264   ;;  %v311_v60 = vlaneseq  ;;  %s458_s25 = smov 96  }
   0x7   :  { %384 = vmatpush3.msra.mxu0 %v26_v3  ;;  %396 = vmatpush3.msra.mxu1 %v144_v5  ;;  %v23_v10 = vld [vmem:[%s578_s0 + $0x10] sm:$0xff]  ;;  %v24_v11 = vld [vmem:[%s578_s0 + $0x18] sm:$0xff]  ;;  %v139_v14 = vld [vmem:[%s581_s3 + $0x8] sm:$0xff]  ;;  %s459_s26 = smov 64   ;;  %s460_s27 = smov [#allocation2]   ;;  %vm332_vm7 = vcmask 785408  }
   0x8   :  { %385 = vmatprep.subr.mxu0 %v25_v6  ;;  %397 = vmatprep.subr.mxu1 %v143_v7  ;;  %v141_v12 = vld [vmem:[%s581_s3 + $0x18] sm:$0xff]  ;;  %v140_v13 = vld [vmem:[%s581_s3 + $0x10] sm:$0xff]  ;;  %v138_v15 = vld [vmem:[%s581_s3] sm:$0xff]  ;;  %v312_v1 = vand.u32 127, %v311_v60  ;;  %s341_s28 = sshll.u32 %s460_s27, 4  ;;  %s342_s28 = int_to_ptr.vmem [resolvable:$true] %s341_s28 }
   0x9   :  { %386 = vmatpush3.msra.mxu0 %v25_v6  ;;  %398 = vmatpush3.msra.mxu1 %v143_v7  ;;  %v349_v16 = vld [vmem:[%s580_s2] ss:$0 sm:$0xff]  ;;  %s435_s29 = scalar_lea.vmem %s342_s28, 128  ;;  %p440_p1 = scmp.lt.s32.totalorder %s342_s28, %s342_s28 }
   0xa   :  { %388 = vmatmul.mubr.msk.f32.vlgmr.msra.gmra.mxu0 %vm36_vm0, %v22_v8  ;;  %399 = vmatprep.subr.mxu1 %v142_v9  ;;  %v354_v29 = vld [vmem:[%s582_s4] ss:$0 sm:$0xff]  ;;  %vm313_vm3 = vcmp.lt.s32.totalorder %v312_v1, 16  ;;  %s457_s4 = smov 32   ;;  %p436_p0 = scmp.ne.s32.totalorder %s342_s28, %s435_s29 }
   0xb   :  { %390 = vmatprep.mubr.msk.f32.mxu0 %vm36_vm0, %v23_v10  ;;  %400 = vmatpush3.msra.mxu1 %v142_v9  ;;  %p441_p2 = scmp.lt.s32.totalorder %s435_s29, %s435_s29 }
   0xc   :  { %401 = vmatprep.subr.mxu1 %v141_v12 }
   0xd   :  { %402 = vmatpush3.msra.mxu1 %v141_v12  ;;  %p442_p3 = por %p441_p2, %p440_p1 }
   0xe   :  { %391 = vmatmul.mubr.msk.f32.gmra.mxu0 %vm36_vm0, %v24_v11  ;;  %403 = vmatprep.subr.mxu1 %v140_v13 }
   0xf   :  { %404 = vmatpush3.msra.mxu1 %v140_v13  ;;  %p443_p4 = pnand %p442_p3, %p436_p0 }
  0x10   :  { %405 = vmatprep.subr.mxu1 %v139_v14 }
  0x11   :  { %406 = vmatpush3.msra.mxu1 %v139_v14 }
  0x12   :  { %407 = vmatprep.subr.mxu1 %v138_v15 }
  0x13   :  { %408 = vmatpush3.msra.mxu1 %v138_v15 }
  0xca   :  { %v389_v17 = vpop.f32.mrf.mxu0 }
  0xcb   :  { %v121_v18 = vadd.f32 %v389_v17, %v349_v16 }
  0xcc   :  { %v115_v19 = vpop.f32.mrf.mxu0 }
  0xcd   :  { %v116_v20 = vadd.f32 %v349_v16, %v115_v19  ;;  %v135_v23 = vmax.f32 %v121_v18, 0.0 }
  0xce   :  { %v392_v21 = vpop.f32.mrf.mxu0 }
  0xcf   :  { %v134_v22 = vmax.f32 %v116_v20, 0.0  ;;  %v131_v24 = vadd.f32 %v392_v21, %v349_v16 }
  0xd0   :  { %v125_v25 = vpop.f32.mrf.mxu0 }
  0xd1   :  { %v126_v26 = vadd.f32 %v349_v16, %v125_v25  ;;  %409 = vmatprep.mubr.msk.f32.mxu1 %vm153_vm1, %v134_v22  ;;  %v137_v28 = vmax.f32 %v131_v24, 0.0 }
  0xd2   :  { %410 = vmatmul.mubr.msk.f32.vlgmr.msra.gmra.mxu1 %vm153_vm1, %v135_v23 }
  0xd3   :  { %v136_v27 = vmax.f32 %v126_v26, 0.0 }
  0xd5   :  { %412 = vmatprep.mubr.msk.f32.mxu1 %vm153_vm1, %v136_v27 }
  0xd6   :  { %413 = vmatmul.mubr.msk.f32.gmra.mxu1 %vm153_vm1, %v137_v28 }
 0x192   :  { %v411_v30 = vpop.f32.mrf.mxu1 }
 0x193   :  { %v553_v31 = vadd.f32 %v411_v30, %v354_v29 }
 0x194   :  { %v232_v32 = vpop.f32.mrf.mxu1 }
 0x195   :  { %v256_v33 = vand.u32 2147483647, %v553_v31  ;;  %v556_v34 = vadd.f32 %v354_v29, %v232_v32  ;;  %v252_v9 = vmax.f32 %v553_v31, 0.0 }
 0x196   :  { %v414_v35 = vpop.f32.mrf.mxu1 }
 0x197   :  { %v260_v36 = vsub.f32 0.0, %v256_v33  ;;  %v255_v37 = vand.u32 2147483647, %v556_v34  ;;  %v559_v38 = vadd.f32 %v414_v35, %v354_v29  ;;  %v251_v16 = vmax.f32 %v556_v34, 0.0 }
 0x198   :  { %v242_v39 = vpop.f32.mrf.mxu1 }
 0x199   :  { %v265_v40 = vmul.f32 1.442695, %v260_v36  ;;  %v259_v41 = vsub.f32 0.0, %v255_v37  ;;  %v258_v42 = vand.u32 2147483647, %v559_v38  ;;  %v562_v43 = vadd.f32 %v354_v29, %v242_v39 }
 0x19a   :  { %v254_v23 = vmax.f32 %v559_v38, 0.0 }
 0x19b   :  { %419 = vpow2.f32 %v265_v40  ;;  %v263_v44 = vmul.f32 1.442695, %v259_v41  ;;  %v262_v45 = vsub.f32 0.0, %v258_v42  ;;  %v257_v46 = vand.u32 2147483647, %v562_v43 }
 0x19c   :  { %v253_v31 = vmax.f32 %v562_v43, 0.0 }
 0x19d   :  { %421 = vpow2.f32 %v263_v44  ;;  %v269_v47 = vmul.f32 1.442695, %v262_v45  ;;  %v261_v48 = vsub.f32 0.0, %v257_v46 }
 0x19f   :  { %423 = vpow2.f32 %v269_v47  ;;  %v267_v49 = vmul.f32 1.442695, %v261_v48 }
 0x1a1   :  { %425 = vpow2.f32 %v267_v49 }
 0x1a8   :  { %v420_v50 = vpop.eup %419 }
 0x1a9   :  { %v280_v51 = vadd.f32 1.0, %v420_v50  ;;  %v283_v58 = vmul.f32 -0.5, %v420_v50  ;;  %v286_v63 = vand.u32 2147483647, %v420_v50 }
 0x1aa   :  { %v422_v52 = vpop.eup %421 }
 0x1ab   :  { %427 = vlog2.f32 %v280_v51  ;;  %v271_v53 = vadd.f32 1.0, %v422_v52  ;;  %v274_v59 = vmul.f32 -0.5, %v422_v52  ;;  %v284_v61 = vadd.f32 1.0, %v283_v58 }
 0x1ac   :  { %v424_v54 = vpop.eup %423  ;;  %v277_v3 = vand.u32 2147483647, %v422_v52  ;;  %vm287_vm2 = vcmp.lt.f32.partialorder %v286_v63, 0.0004427343 }
 0x1ad   :  { %429 = vlog2.f32 %v271_v53  ;;  %v298_v55 = vadd.f32 1.0, %v424_v54  ;;  %v301_v62 = vmul.f32 -0.5, %v424_v54  ;;  %v275_v0 = vadd.f32 1.0, %v274_v59 }
 0x1ae   :  { %v426_v56 = vpop.eup %425  ;;  %v285_v6 = vmul.f32 %v420_v50, %v284_v61  ;;  %v304_v10 = vand.u32 2147483647, %v424_v54  ;;  %vm278_vm4 = vcmp.lt.f32.partialorder %v277_v3, 0.0004427343 }
 0x1af   :  { %431 = vlog2.f32 %v298_v55  ;;  %v289_v57 = vadd.f32 1.0, %v426_v56  ;;  %v292_v4 = vmul.f32 -0.5, %v426_v56  ;;  %v302_v7 = vadd.f32 1.0, %v301_v62 }
 0x1b0   :  { %v276_v13 = vmul.f32 %v422_v52, %v275_v0  ;;  %v295_v21 = vand.u32 2147483647, %v426_v56  ;;  %vm305_vm5 = vcmp.lt.f32.partialorder %v304_v10, 0.0004427343 }
 0x1b1   :  { %433 = vlog2.f32 %v289_v57  ;;  %v293_v17 = vadd.f32 1.0, %v292_v4  ;;  %v303_v20 = vmul.f32 %v424_v54, %v302_v7 }
 0x1b2   :  { %vm296_vm6 = vcmp.lt.f32.partialorder %v295_v21, 0.0004427343 }
 0x1b3   :  { %v294_v29 = vmul.f32 %v426_v56, %v293_v17 }
 0x1b8   :  { %v428_v2 = vpop.eup %427 }
 0x1b9   :  { %v282_v5 = vmul.f32 0.6931472, %v428_v2 }
 0x1ba   :  { %v430_v8 = vpop.eup %429 }
 0x1bb   :  { %v288_v11 = vsel %vm287_vm2, %v285_v6, %v282_v5  ;;  %v273_v12 = vmul.f32 0.6931472, %v430_v8 }
 0x1bc   :  { %v432_v14 = vpop.eup %431  ;;  %v308_v15 = vadd.f32 %v288_v11, %v252_v9 }
 0x1bd   :  { %v279_v18 = vsel %vm278_vm4, %v276_v13, %v273_v12  ;;  %v300_v19 = vmul.f32 0.6931472, %v432_v14 }
 0x1be   :  { %v307_v22 = vadd.f32 %v279_v18, %v251_v16  ;;  %v315_v24 = vsel %vm313_vm3, %v252_v9, %v308_v15  ;;  %v434_v25 = vpop.eup %433 }
 0x1bf   :  { %v306_v26 = vsel %vm305_vm5, %v303_v20, %v300_v19  ;;  %319 = vrot.lane.b32.xlu0 %v315_v24, %s457_s4  ;;  %v291_v28 = vmul.f32 0.6931472, %v434_v25 }
 0x1c0   :  { %v310_v27 = vadd.f32 %v306_v26, %v254_v23  ;;  %v314_v30 = vsel %vm313_vm3, %v251_v16, %v307_v22 }
 0x1c1   :  { %v297_v32 = vsel %vm296_vm6, %v294_v29, %v291_v28 }
 0x1c2   :  { %v317_v33 = vsel %vm313_vm3, %v254_v23, %v310_v27  ;;  %v309_v34 = vadd.f32 %v297_v32, %v253_v31 }
 0x1c3   :  { %327 = vrot.lane.b32.xlu1 %v317_v33, %s458_s25 }
 0x1c4   :  { %v316_v35 = vsel %vm313_vm3, %v253_v31, %v309_v34 }
 0x1c5   :  { %323 = vrot.lane.b32.xlu0 %v316_v35, %s459_s26 }
 0x231   :  { %v320_v36 = vpop.permute.xlu0 %319 }
 0x232   :  { %v330_v37 = vsel %vm36_vm0, %v314_v30, %v320_v36 }
 0x235   :  { %v328_v39 = vpop.permute.xlu1 %327 }
 0x237   :  { %v324_v38 = vpop.permute.xlu0 %323 }
 0x238   :  { %v331_v40 = vsel %vm153_vm1, %v330_v37, %v324_v38 }
 0x239   :  { %v333_v41 = vsel %vm332_vm7, %v331_v40, %v328_v39 }
 0x23a   :  { %334 = vst [vmem:[#allocation2] sm:$0xff] %v333_v41 }
 0x23b   :  { %446 = shalt.err (!%p443_p4)
}
 0x23c   :  { %344 = dma.vmem_to_hbm [thread:$0]  %s342_s28, 128, %s583_s5, [#allocation3]  }
 0x23d   :  { %455 = dma.done.wait [#allocation3], 128  }
 0x23e   :  { %456 = vsyncadd [#allocation3], 4294967168 }
 0x23f   :  { %348 = vsyncpa [#allocation3], 1 }

// kernel: tpu_custom_call.1
= control target key start
LH: loop header
LB: loop body
LE: loop exit
PB: predicated region body
PF: predicated region fallthrough
CT: control target
= control target key end

     0   :  { %vm36_vm0 = vcmask 261120   ;;  %s578_s0 = inlined_call_operand.vmem [shape: f32[32,32], index: 0, kind: input, shape index: {}]   ;;  %s579_s1 = inlined_call_operand.vmem [shape: f32[32,64], index: 1, kind: input, shape index: {}]   ;;  %s580_s2 = inlined_call_operand.vmem [shape: f32[1,64], index: 2, kind: input, shape index: {}]   ;;  %s581_s3 = inlined_call_operand.vmem [shape: f32[64,32], index: 3, kind: input, shape index: {}]   ;;  %s582_s4 = inlined_call_operand.vmem [shape: f32[1,32], index: 4, kind: input, shape index: {}]   ;;  %s583_s5 = inlined_call_operand.hbm [shape: f32[8,128], index: 5, kind: output, shape index: {}]  }
   0x1   :  { %v28_v0 = vld [vmem:[%s579_s1 + $0x18] sm:$0xff]  ;;  %v27_v1 = vld [vmem:[%s579_s1 + $0x10] sm:$0xff]  ;;  %v21_v2 = vld [vmem:[%s578_s0] sm:$0xff] }
   0x2   :  { %379 = vmatprep.subr.mxu0 %v28_v0  ;;  %v26_v3 = vld [vmem:[%s579_s1 + $0x8] sm:$0xff]  ;;  %387 = vmatprep.mubr.msk.f32.mxu0 %vm36_vm0, %v21_v2  ;;  %v145_v4 = vld [vmem:[%s581_s3 + $0x38] sm:$0xff]  ;;  %v144_v5 = vld [vmem:[%s581_s3 + $0x30] sm:$0xff] }
   0x3   :  { %380 = vmatpush3.msra.mxu0 %v28_v0  ;;  %393 = vmatprep.subr.mxu1 %v145_v4  ;;  %v25_v6 = vld [vmem:[%s579_s1] sm:$0xff]  ;;  %v143_v7 = vld [vmem:[%s581_s3 + $0x28] sm:$0xff] }
   0x4   :  { %381 = vmatprep.subr.mxu0 %v27_v1  ;;  %394 = vmatpush3.msra.mxu1 %v145_v4 }
   0x5   :  { %382 = vmatpush3.msra.mxu0 %v27_v1 }
   0x6   :  { %10 = vsyncpa [#allocation3], 0  ;;  %383 = vmatprep.subr.mxu0 %v26_v3  ;;  %395 = vmatprep.subr.mxu1 %v144_v5  ;;  %v22_v8 = vld [vmem:[%s578_s0 + $0x8] sm:$0xff]  ;;  %v142_v9 = vld [vmem:[%s581_s3 + $0x20] sm:$0xff]  ;;  %vm153_vm1 = vcmask 523264   ;;  %v311_v60 = vlaneseq  ;;  %s458_s25 = smov 96  }
   0x7   :  { %384 = vmatpush3.msra.mxu0 %v26_v3  ;;  %396 = vmatpush3.msra.mxu1 %v144_v5  ;;  %v23_v10 = vld [vmem:[%s578_s0 + $0x10] sm:$0xff]  ;;  %v24_v11 = vld [vmem:[%s578_s0 + $0x18] sm:$0xff]  ;;  %v139_v14 = vld [vmem:[%s581_s3 + $0x8] sm:$0xff]  ;;  %s459_s26 = smov 64   ;;  %s460_s27 = smov [#allocation2]   ;;  %vm332_vm7 = vcmask 785408  }
   0x8   :  { %385 = vmatprep.subr.mxu0 %v25_v6  ;;  %397 = vmatprep.subr.mxu1 %v143_v7  ;;  %v141_v12 = vld [vmem:[%s581_s3 + $0x18] sm:$0xff]  ;;  %v140_v13 = vld [vmem:[%s581_s3 + $0x10] sm:$0xff]  ;;  %v138_v15 = vld [vmem:[%s581_s3] sm:$0xff]  ;;  %v312_v1 = vand.u32 127, %v311_v60  ;;  %s341_s28 = sshll.u32 %s460_s27, 4  ;;  %s342_s28 = int_to_ptr.vmem [resolvable:$true] %s341_s28 }
   0x9   :  { %386 = vmatpush3.msra.mxu0 %v25_v6  ;;  %398 = vmatpush3.msra.mxu1 %v143_v7  ;;  %v349_v16 = vld [vmem:[%s580_s2] ss:$0 sm:$0xff]  ;;  %s435_s29 = scalar_lea.vmem %s342_s28, 128  ;;  %p440_p1 = scmp.lt.s32.totalorder %s342_s28, %s342_s28 }
   0xa   :  { %388 = vmatmul.mubr.msk.f32.vlgmr.msra.gmra.mxu0 %vm36_vm0, %v22_v8  ;;  %399 = vmatprep.subr.mxu1 %v142_v9  ;;  %v354_v29 = vld [vmem:[%s582_s4] ss:$0 sm:$0xff]  ;;  %vm313_vm3 = vcmp.lt.s32.totalorder %v312_v1, 16  ;;  %s457_s4 = smov 32   ;;  %p436_p0 = scmp.ne.s32.totalorder %s342_s28, %s435_s29 }
   0xb   :  { %390 = vmatprep.mubr.msk.f32.mxu0 %vm36_vm0, %v23_v10  ;;  %400 = vmatpush3.msra.mxu1 %v142_v9  ;;  %p441_p2 = scmp.lt.s32.totalorder %s435_s29, %s435_s29 }
   0xc   :  { %401 = vmatprep.subr.mxu1 %v141_v12 }
   0xd   :  { %402 = vmatpush3.msra.mxu1 %v141_v12  ;;  %p442_p3 = por %p441_p2, %p440_p1 }
   0xe   :  { %391 = vmatmul.mubr.msk.f32.gmra.mxu0 %vm36_vm0, %v24_v11  ;;  %403 = vmatprep.subr.mxu1 %v140_v13 }
   0xf   :  { %404 = vmatpush3.msra.mxu1 %v140_v13  ;;  %p443_p4 = pnand %p442_p3, %p436_p0 }
  0x10   :  { %405 = vmatprep.subr.mxu1 %v139_v14 }
  0x11   :  { %406 = vmatpush3.msra.mxu1 %v139_v14 }
  0x12   :  { %407 = vmatprep.subr.mxu1 %v138_v15 }
  0x13   :  { %408 = vmatpush3.msra.mxu1 %v138_v15 }
  0xca   :  { %v389_v17 = vpop.f32.mrf.mxu0 }
  0xcb   :  { %v121_v18 = vadd.f32 %v389_v17, %v349_v16 }
  0xcc   :  { %v115_v19 = vpop.f32.mrf.mxu0 }
  0xcd   :  { %v116_v20 = vadd.f32 %v349_v16, %v115_v19  ;;  %v135_v23 = vmax.f32 %v121_v18, 0.0 }
  0xce   :  { %v392_v21 = vpop.f32.mrf.mxu0 }
  0xcf   :  { %v134_v22 = vmax.f32 %v116_v20, 0.0  ;;  %v131_v24 = vadd.f32 %v392_v21, %v349_v16 }
  0xd0   :  { %v125_v25 = vpop.f32.mrf.mxu0 }
  0xd1   :  { %v126_v26 = vadd.f32 %v349_v16, %v125_v25  ;;  %409 = vmatprep.mubr.msk.f32.mxu1 %vm153_vm1, %v134_v22  ;;  %v137_v28 = vmax.f32 %v131_v24, 0.0 }
  0xd2   :  { %410 = vmatmul.mubr.msk.f32.vlgmr.msra.gmra.mxu1 %vm153_vm1, %v135_v23 }
  0xd3   :  { %v136_v27 = vmax.f32 %v126_v26, 0.0 }
  0xd5   :  { %412 = vmatprep.mubr.msk.f32.mxu1 %vm153_vm1, %v136_v27 }
  0xd6   :  { %413 = vmatmul.mubr.msk.f32.gmra.mxu1 %vm153_vm1, %v137_v28 }
 0x192   :  { %v411_v30 = vpop.f32.mrf.mxu1 }
 0x193   :  { %v553_v31 = vadd.f32 %v411_v30, %v354_v29 }
 0x194   :  { %v232_v32 = vpop.f32.mrf.mxu1 }
 0x195   :  { %v256_v33 = vand.u32 2147483647, %v553_v31  ;;  %v556_v34 = vadd.f32 %v354_v29, %v232_v32  ;;  %v252_v9 = vmax.f32 %v553_v31, 0.0 }
 0x196   :  { %v414_v35 = vpop.f32.mrf.mxu1 }
 0x197   :  { %v260_v36 = vsub.f32 0.0, %v256_v33  ;;  %v255_v37 = vand.u32 2147483647, %v556_v34  ;;  %v559_v38 = vadd.f32 %v414_v35, %v354_v29  ;;  %v251_v16 = vmax.f32 %v556_v34, 0.0 }
 0x198   :  { %v242_v39 = vpop.f32.mrf.mxu1 }
 0x199   :  { %v265_v40 = vmul.f32 1.442695, %v260_v36  ;;  %v259_v41 = vsub.f32 0.0, %v255_v37  ;;  %v258_v42 = vand.u32 2147483647, %v559_v38  ;;  %v562_v43 = vadd.f32 %v354_v29, %v242_v39 }
 0x19a   :  { %v254_v23 = vmax.f32 %v559_v38, 0.0 }
 0x19b   :  { %419 = vpow2.f32 %v265_v40  ;;  %v263_v44 = vmul.f32 1.442695, %v259_v41  ;;  %v262_v45 = vsub.f32 0.0, %v258_v42  ;;  %v257_v46 = vand.u32 2147483647, %v562_v43 }
 0x19c   :  { %v253_v31 = vmax.f32 %v562_v43, 0.0 }
 0x19d   :  { %421 = vpow2.f32 %v263_v44  ;;  %v269_v47 = vmul.f32 1.442695, %v262_v45  ;;  %v261_v48 = vsub.f32 0.0, %v257_v46 }
 0x19f   :  { %423 = vpow2.f32 %v269_v47  ;;  %v267_v49 = vmul.f32 1.442695, %v261_v48 }
 0x1a1   :  { %425 = vpow2.f32 %v267_v49 }
 0x1a8   :  { %v420_v50 = vpop.eup %419 }
 0x1a9   :  { %v280_v51 = vadd.f32 1.0, %v420_v50  ;;  %v283_v58 = vmul.f32 -0.5, %v420_v50  ;;  %v286_v63 = vand.u32 2147483647, %v420_v50 }
 0x1aa   :  { %v422_v52 = vpop.eup %421 }
 0x1ab   :  { %427 = vlog2.f32 %v280_v51  ;;  %v271_v53 = vadd.f32 1.0, %v422_v52  ;;  %v274_v59 = vmul.f32 -0.5, %v422_v52  ;;  %v284_v61 = vadd.f32 1.0, %v283_v58 }
 0x1ac   :  { %v424_v54 = vpop.eup %423  ;;  %v277_v3 = vand.u32 2147483647, %v422_v52  ;;  %vm287_vm2 = vcmp.lt.f32.partialorder %v286_v63, 0.0004427343 }
 0x1ad   :  { %429 = vlog2.f32 %v271_v53  ;;  %v298_v55 = vadd.f32 1.0, %v424_v54  ;;  %v301_v62 = vmul.f32 -0.5, %v424_v54  ;;  %v275_v0 = vadd.f32 1.0, %v274_v59 }
 0x1ae   :  { %v426_v56 = vpop.eup %425  ;;  %v285_v6 = vmul.f32 %v420_v50, %v284_v61  ;;  %v304_v10 = vand.u32 2147483647, %v424_v54  ;;  %vm278_vm4 = vcmp.lt.f32.partialorder %v277_v3, 0.0004427343 }
 0x1af   :  { %431 = vlog2.f32 %v298_v55  ;;  %v289_v57 = vadd.f32 1.0, %v426_v56  ;;  %v292_v4 = vmul.f32 -0.5, %v426_v56  ;;  %v302_v7 = vadd.f32 1.0, %v301_v62 }
 0x1b0   :  { %v276_v13 = vmul.f32 %v422_v52, %v275_v0  ;;  %v295_v21 = vand.u32 2147483647, %v426_v56  ;;  %vm305_vm5 = vcmp.lt.f32.partialorder %v304_v10, 0.0004427343 }
 0x1b1   :  { %433 = vlog2.f32 %v289_v57  ;;  %v293_v17 = vadd.f32 1.0, %v292_v4  ;;  %v303_v20 = vmul.f32 %v424_v54, %v302_v7 }
 0x1b2   :  { %vm296_vm6 = vcmp.lt.f32.partialorder %v295_v21, 0.0004427343 }
 0x1b3   :  { %v294_v29 = vmul.f32 %v426_v56, %v293_v17 }
 0x1b8   :  { %v428_v2 = vpop.eup %427 }
 0x1b9   :  { %v282_v5 = vmul.f32 0.6931472, %v428_v2 }
 0x1ba   :  { %v430_v8 = vpop.eup %429 }
 0x1bb   :  { %v288_v11 = vsel %vm287_vm2, %v285_v6, %v282_v5  ;;  %v273_v12 = vmul.f32 0.6931472, %v430_v8 }
 0x1bc   :  { %v432_v14 = vpop.eup %431  ;;  %v308_v15 = vadd.f32 %v288_v11, %v252_v9 }
 0x1bd   :  { %v279_v18 = vsel %vm278_vm4, %v276_v13, %v273_v12  ;;  %v300_v19 = vmul.f32 0.6931472, %v432_v14 }
 0x1be   :  { %v307_v22 = vadd.f32 %v279_v18, %v251_v16  ;;  %v315_v24 = vsel %vm313_vm3, %v252_v9, %v308_v15  ;;  %v434_v25 = vpop.eup %433 }
 0x1bf   :  { %v306_v26 = vsel %vm305_vm5, %v303_v20, %v300_v19  ;;  %319 = vrot.lane.b32.xlu0 %v315_v24, %s457_s4  ;;  %v291_v28 = vmul.f32 0.6931472, %v434_v25 }
 0x1c0   :  { %v310_v27 = vadd.f32 %v306_v26, %v254_v23  ;;  %v314_v30 = vsel %vm313_vm3, %v251_v16, %v307_v22 }
 0x1c1   :  { %v297_v32 = vsel %vm296_vm6, %v294_v29, %v291_v28 }
 0x1c2   :  { %v317_v33 = vsel %vm313_vm3, %v254_v23, %v310_v27  ;;  %v309_v34 = vadd.f32 %v297_v32, %v253_v31 }
 0x1c3   :  { %327 = vrot.lane.b32.xlu1 %v317_v33, %s458_s25 }
 0x1c4   :  { %v316_v35 = vsel %vm313_vm3, %v253_v31, %v309_v34 }
 0x1c5   :  { %323 = vrot.lane.b32.xlu0 %v316_v35, %s459_s26 }
 0x231   :  { %v320_v36 = vpop.permute.xlu0 %319 }
 0x232   :  { %v330_v37 = vsel %vm36_vm0, %v314_v30, %v320_v36 }
 0x235   :  { %v328_v39 = vpop.permute.xlu1 %327 }
 0x237   :  { %v324_v38 = vpop.permute.xlu0 %323 }
 0x238   :  { %v331_v40 = vsel %vm153_vm1, %v330_v37, %v324_v38 }
 0x239   :  { %v333_v41 = vsel %vm332_vm7, %v331_v40, %v328_v39 }
 0x23a   :  { %334 = vst [vmem:[#allocation2] sm:$0xff] %v333_v41 }
 0x23b   :  { %446 = shalt.err (!%p443_p4)
}
 0x23c   :  { %344 = dma.vmem_to_hbm [thread:$0]  %s342_s28, 128, %s583_s5, [#allocation3]  }
 0x23d   :  { %455 = dma.done.wait [#allocation3], 128  }
 0x23e   :  { %456 = vsyncadd [#allocation3], 4294967168 }
 0x23f   :  { %348 = vsyncpa [#allocation3], 1 }

// kernel: tpu_custom_call.1
= control target key start
LH: loop header
LB: loop body
LE: loop exit
PB: predicated region body
PF: predicated region fallthrough
CT: control target
= control target key end

     0   :  { %vm36_vm0 = vcmask 261120   ;;  %s563_s0 = inlined_call_operand.vmem [shape: f32[32,32], index: 0, kind: input, shape index: {}]   ;;  %s564_s1 = inlined_call_operand.vmem [shape: f32[32,64], index: 1, kind: input, shape index: {}]   ;;  %s565_s2 = inlined_call_operand.vmem [shape: f32[1,64], index: 2, kind: input, shape index: {}]   ;;  %s566_s3 = inlined_call_operand.vmem [shape: f32[64,32], index: 3, kind: input, shape index: {}]   ;;  %s567_s4 = inlined_call_operand.vmem [shape: f32[1,32], index: 4, kind: input, shape index: {}]   ;;  %s568_s5 = inlined_call_operand.hbm [shape: f32[32,32], index: 5, kind: output, shape index: {}]  }
   0x1   :  { %v28_v0 = vld [vmem:[%s564_s1 + $0x18] sm:$0xff]  ;;  %v27_v1 = vld [vmem:[%s564_s1 + $0x10] sm:$0xff]  ;;  %v21_v2 = vld [vmem:[%s563_s0] sm:$0xff] }
   0x2   :  { %368 = vmatprep.subr.mxu0 %v28_v0  ;;  %v26_v3 = vld [vmem:[%s564_s1 + $0x8] sm:$0xff]  ;;  %376 = vmatprep.mubr.msk.f32.mxu0 %vm36_vm0, %v21_v2  ;;  %v145_v4 = vld [vmem:[%s566_s3 + $0x38] sm:$0xff]  ;;  %v144_v5 = vld [vmem:[%s566_s3 + $0x30] sm:$0xff] }
   0x3   :  { %369 = vmatpush3.msra.mxu0 %v28_v0  ;;  %382 = vmatprep.subr.mxu1 %v145_v4  ;;  %v25_v6 = vld [vmem:[%s564_s1] sm:$0xff]  ;;  %v143_v7 = vld [vmem:[%s566_s3 + $0x28] sm:$0xff] }
   0x4   :  { %370 = vmatprep.subr.mxu0 %v27_v1  ;;  %383 = vmatpush3.msra.mxu1 %v145_v4 }
   0x5   :  { %371 = vmatpush3.msra.mxu0 %v27_v1 }
   0x6   :  { %10 = vsyncpa [#allocation3], 0  ;;  %372 = vmatprep.subr.mxu0 %v26_v3  ;;  %384 = vmatprep.subr.mxu1 %v144_v5  ;;  %v22_v8 = vld [vmem:[%s563_s0 + $0x8] sm:$0xff]  ;;  %v142_v9 = vld [vmem:[%s566_s3 + $0x20] sm:$0xff]  ;;  %vm153_vm1 = vcmask 523264   ;;  %v311_v59 = vlaneseq }
   0x7   :  { %373 = vmatpush3.msra.mxu0 %v26_v3  ;;  %385 = vmatpush3.msra.mxu1 %v144_v5  ;;  %v23_v10 = vld [vmem:[%s563_s0 + $0x10] sm:$0xff]  ;;  %v24_v11 = vld [vmem:[%s563_s0 + $0x18] sm:$0xff]  ;;  %v139_v14 = vld [vmem:[%s566_s3 + $0x8] sm:$0xff] }
   0x8   :  { %374 = vmatprep.subr.mxu0 %v25_v6  ;;  %386 = vmatprep.subr.mxu1 %v143_v7  ;;  %v141_v12 = vld [vmem:[%s566_s3 + $0x18] sm:$0xff]  ;;  %v140_v13 = vld [vmem:[%s566_s3 + $0x10] sm:$0xff]  ;;  %v138_v15 = vld [vmem:[%s566_s3] sm:$0xff]  ;;  %v312_v0 = vand.u32 127, %v311_v59 }
   0x9   :  { %375 = vmatpush3.msra.mxu0 %v25_v6  ;;  %387 = vmatpush3.msra.mxu1 %v143_v7  ;;  %v338_v16 = vld [vmem:[%s565_s2] ss:$0 sm:$0xff]  ;;  %s445_s2 = smov [#allocation2]  }
   0xa   :  { %377 = vmatmul.mubr.msk.f32.vlgmr.msra.gmra.mxu0 %vm36_vm0, %v22_v8  ;;  %388 = vmatprep.subr.mxu1 %v142_v9  ;;  %v343_v29 = vld [vmem:[%s567_s4] ss:$0 sm:$0xff]  ;;  %vm313_vm3 = vcmp.lt.s32.totalorder %v312_v0, 16  ;;  %s327_s4 = sshll.u32 %s445_s2, 4  ;;  %s328_s4 = int_to_ptr.vmem [resolvable:$true] %s327_s4 }
   0xb   :  { %379 = vmatprep.mubr.msk.f32.mxu0 %vm36_vm0, %v23_v10  ;;  %389 = vmatpush3.msra.mxu1 %v142_v9  ;;  %s423_s26 = scalar_lea.vmem %s328_s4, 512  ;;  %p428_p1 = scmp.lt.s32.totalorder %s328_s4, %s328_s4 }
   0xc   :  { %390 = vmatprep.subr.mxu1 %v141_v12  ;;  %p424_p0 = scmp.ne.s32.totalorder %s328_s4, %s423_s26  ;;  %p429_p2 = scmp.lt.s32.totalorder %s423_s26, %s423_s26 }
   0xd   :  { %391 = vmatpush3.msra.mxu1 %v141_v12 }
   0xe   :  { %380 = vmatmul.mubr.msk.f32.gmra.mxu0 %vm36_vm0, %v24_v11  ;;  %392 = vmatprep.subr.mxu1 %v140_v13  ;;  %p430_p3 = por %p429_p2, %p428_p1 }
   0xf   :  { %393 = vmatpush3.msra.mxu1 %v140_v13 }
  0x10   :  { %394 = vmatprep.subr.mxu1 %v139_v14  ;;  %p431_p4 = pnand %p430_p3, %p424_p0 }
  0x11   :  { %395 = vmatpush3.msra.mxu1 %v139_v14 }
  0x12   :  { %396 = vmatprep.subr.mxu1 %v138_v15 }
  0x13   :  { %397 = vmatpush3.msra.mxu1 %v138_v15 }
  0xca   :  { %v378_v17 = vpop.f32.mrf.mxu0 }
  0xcb   :  { %v121_v18 = vadd.f32 %v378_v17, %v338_v16 }
  0xcc   :  { %v115_v19 = vpop.f32.mrf.mxu0 }
  0xcd   :  { %v116_v20 = vadd.f32 %v338_v16, %v115_v19  ;;  %v135_v23 = vmax.f32 %v121_v18, 0.0 }
  0xce   :  { %v381_v21 = vpop.f32.mrf.mxu0 }
  0xcf   :  { %v134_v22 = vmax.f32 %v116_v20, 0.0  ;;  %v131_v24 = vadd.f32 %v381_v21, %v338_v16 }
  0xd0   :  { %v125_v25 = vpop.f32.mrf.mxu0 }
  0xd1   :  { %v126_v26 = vadd.f32 %v338_v16, %v125_v25  ;;  %398 = vmatprep.mubr.msk.f32.mxu1 %vm153_vm1, %v134_v22  ;;  %v137_v28 = vmax.f32 %v131_v24, 0.0 }
  0xd2   :  { %399 = vmatmul.mubr.msk.f32.vlgmr.msra.gmra.mxu1 %vm153_vm1, %v135_v23 }
  0xd3   :  { %v136_v27 = vmax.f32 %v126_v26, 0.0 }
  0xd5   :  { %401 = vmatprep.mubr.msk.f32.mxu1 %vm153_vm1, %v136_v27 }
  0xd6   :  { %402 = vmatmul.mubr.msk.f32.gmra.mxu1 %vm153_vm1, %v137_v28 }
 0x192   :  { %v400_v30 = vpop.f32.mrf.mxu1 }
 0x193   :  { %v536_v31 = vadd.f32 %v400_v30, %v343_v29 }
 0x194   :  { %v232_v32 = vpop.f32.mrf.mxu1 }
 0x195   :  { %v256_v33 = vand.u32 2147483647, %v536_v31  ;;  %v539_v34 = vadd.f32 %v343_v29, %v232_v32  ;;  %v252_v9 = vmax.f32 %v536_v31, 0.0 }
 0x196   :  { %v403_v35 = vpop.f32.mrf.mxu1 }
 0x197   :  { %v260_v36 = vsub.f32 0.0, %v256_v33  ;;  %v255_v37 = vand.u32 2147483647, %v539_v34  ;;  %v542_v38 = vadd.f32 %v403_v35, %v343_v29  ;;  %v251_v16 = vmax.f32 %v539_v34, 0.0 }
 0x198   :  { %v242_v39 = vpop.f32.mrf.mxu1 }
 0x199   :  { %v265_v40 = vmul.f32 1.442695, %v260_v36  ;;  %v259_v41 = vsub.f32 0.0, %v255_v37  ;;  %v258_v42 = vand.u32 2147483647, %v542_v38  ;;  %v545_v43 = vadd.f32 %v343_v29, %v242_v39 }
 0x19a   :  { %v254_v24 = vmax.f32 %v542_v38, 0.0 }
 0x19b   :  { %407 = vpow2.f32 %v265_v40  ;;  %v263_v44 = vmul.f32 1.442695, %v259_v41  ;;  %v262_v45 = vsub.f32 0.0, %v258_v42  ;;  %v257_v46 = vand.u32 2147483647, %v545_v43 }
 0x19c   :  { %v253_v31 = vmax.f32 %v545_v43, 0.0 }
 0x19d   :  { %409 = vpow2.f32 %v263_v44  ;;  %v269_v47 = vmul.f32 1.442695, %v262_v45  ;;  %v261_v48 = vsub.f32 0.0, %v257_v46 }
 0x19f   :  { %411 = vpow2.f32 %v269_v47  ;;  %v267_v49 = vmul.f32 1.442695, %v261_v48 }
 0x1a1   :  { %413 = vpow2.f32 %v267_v49 }
 0x1a8   :  { %v408_v50 = vpop.eup %407 }
 0x1a9   :  { %v280_v51 = vadd.f32 1.0, %v408_v50  ;;  %v283_v58 = vmul.f32 -0.5, %v408_v50  ;;  %v286_v63 = vand.u32 2147483647, %v408_v50 }
 0x1aa   :  { %v410_v52 = vpop.eup %409 }
 0x1ab   :  { %415 = vlog2.f32 %v280_v51  ;;  %v271_v53 = vadd.f32 1.0, %v410_v52  ;;  %v274_v60 = vmul.f32 -0.5, %v410_v52  ;;  %v284_v61 = vadd.f32 1.0, %v283_v58 }
 0x1ac   :  { %v412_v54 = vpop.eup %411  ;;  %v277_v3 = vand.u32 2147483647, %v410_v52  ;;  %vm287_vm2 = vcmp.lt.f32.partialorder %v286_v63, 0.0004427343 }
 0x1ad   :  { %417 = vlog2.f32 %v271_v53  ;;  %v298_v55 = vadd.f32 1.0, %v412_v54  ;;  %v301_v62 = vmul.f32 -0.5, %v412_v54  ;;  %v275_v1 = vadd.f32 1.0, %v274_v60 }
 0x1ae   :  { %v414_v56 = vpop.eup %413  ;;  %v285_v6 = vmul.f32 %v408_v50, %v284_v61  ;;  %v304_v10 = vand.u32 2147483647, %v412_v54  ;;  %vm278_vm4 = vcmp.lt.f32.partialorder %v277_v3, 0.0004427343 }
 0x1af   :  { %419 = vlog2.f32 %v298_v55  ;;  %v289_v57 = vadd.f32 1.0, %v414_v56  ;;  %v292_v4 = vmul.f32 -0.5, %v414_v56  ;;  %v302_v7 = vadd.f32 1.0, %v301_v62 }
 0x1b0   :  { %v276_v13 = vmul.f32 %v410_v52, %v275_v1  ;;  %v295_v21 = vand.u32 2147483647, %v414_v56  ;;  %vm305_vm5 = vcmp.lt.f32.partialorder %v304_v10, 0.0004427343 }
 0x1b1   :  { %421 = vlog2.f32 %v289_v57  ;;  %v293_v17 = vadd.f32 1.0, %v292_v4  ;;  %v303_v20 = vmul.f32 %v412_v54, %v302_v7 }
 0x1b2   :  { %vm296_vm6 = vcmp.lt.f32.partialorder %v295_v21, 0.0004427343 }
 0x1b3   :  { %v294_v30 = vmul.f32 %v414_v56, %v293_v17 }
 0x1b8   :  { %v416_v2 = vpop.eup %415 }
 0x1b9   :  { %v282_v5 = vmul.f32 0.6931472, %v416_v2 }
 0x1ba   :  { %v418_v8 = vpop.eup %417 }
 0x1bb   :  { %v288_v11 = vsel %vm287_vm2, %v285_v6, %v282_v5  ;;  %v273_v12 = vmul.f32 0.6931472, %v418_v8 }
 0x1bc   :  { %v420_v14 = vpop.eup %419  ;;  %v308_v15 = vadd.f32 %v288_v11, %v252_v9 }
 0x1bd   :  { %v279_v18 = vsel %vm278_vm4, %v276_v13, %v273_v12  ;;  %v300_v19 = vmul.f32 0.6931472, %v420_v14 }
 0x1be   :  { %v315_v22 = vsel %vm313_vm3, %v252_v9, %v308_v15  ;;  %v307_v23 = vadd.f32 %v279_v18, %v251_v16  ;;  %v422_v25 = vpop.eup %421 }
 0x1bf   :  { %319 = vst.msk [vmem:[#allocation2 + $0x8] sm:$0xff] %vm36_vm0, %v315_v22  ;;  %v306_v26 = vsel %vm305_vm5, %v303_v20, %v300_v19  ;;  %v291_v29 = vmul.f32 0.6931472, %v422_v25 }
 0x1c0   :  { %v314_v27 = vsel %vm313_vm3, %v251_v16, %v307_v23  ;;  %v310_v28 = vadd.f32 %v306_v26, %v254_v24 }
 0x1c1   :  { %318 = vst.msk [vmem:[#allocation2] sm:$0xff] %vm36_vm0, %v314_v27  ;;  %v297_v33 = vsel %vm296_vm6, %v294_v30, %v291_v29 }
 0x1c2   :  { %v317_v32 = vsel %vm313_vm3, %v254_v24, %v310_v28  ;;  %v309_v34 = vadd.f32 %v297_v33, %v253_v31 }
 0x1c3   :  { %321 = vst.msk [vmem:[#allocation2 + $0x18] sm:$0xff] %vm36_vm0, %v317_v32 }
 0x1c4   :  { %v316_v35 = vsel %vm313_vm3, %v253_v31, %v309_v34 }
 0x1c5   :  { %320 = vst.msk [vmem:[#allocation2 + $0x10] sm:$0xff] %vm36_vm0, %v316_v35 }
 0x1c6   :  { %434 = shalt.err (!%p431_p4)
}
 0x1c7   :  { %s446_s27 = smov 128   ;;  %s447_s28 = smov 8  }
 0x1c8   :  { %333 = dma.vmem_to_hbm [thread:$0]  %s328_s4, 512, %s568_s5, [#allocation3], %s446_s27, %s446_s27, %s447_s28  }
 0x1c9   :  { %443 = dma.done.wait [#allocation3], 512  }
 0x1ca   :  { %444 = vsyncadd [#allocation3], 4294966784 }
 0x1cb   :  { %337 = vsyncpa [#allocation3], 1 }

</bundles_post_ra>
